<compile_context>
chip_gen: v5e
topology: v5e:2x2
jax: 0.10.0
libtpu: 0.0.40
codegen_flags: <defaults>
</compile_context>

<pallas_src>
import jax
import jax.numpy as jnp
from jax.experimental import pallas as pl
from jax.experimental.pallas import tpu as pltpu

LANE = 128
SUBLANE = 8
BATCH_TILE = 512  # batch tile for the large-batch (gridded) path


def fc_kernel(x_ref, w1_ref, b1_ref, w2_ref, b2_ref, o_ref):
    # ---- Linear 1: (B, D) @ (D, H) + (1, H) ----
    h = jnp.dot(x_ref[...], w1_ref[...], preferred_element_type=jnp.float32)
    # ---- ReLU ----
    h = jnp.maximum(h + b1_ref[...], 0.0)
    # ---- Linear 2: (B, H) @ (H, C_pad) + (1, C_pad)  (C_pad = 128, lane-dense) ----
    z = jnp.dot(h, w2_ref[...], preferred_element_type=jnp.float32) + b2_ref[...]
    # ---- Sigmoid (module's "softmax" attribute is nn.Sigmoid) ----
    o_ref[...] = jax.nn.sigmoid(z).astype(o_ref.dtype)


def _round_up(n, m):
    return ((n + m - 1) // m) * m


def make_fc_forward(w1_torch, b1, w2_torch, b2):
    """One-time parameter prep + returns a jitted per-call forward(x).

    Weights are accepted in PyTorch nn.Linear layout (out_features, in_features)
    and transposed / padded exactly once here.
    """
    H, D = w1_torch.shape
    C, _ = w2_torch.shape
    C_pad = max(LANE, _round_up(C, LANE))

    # --- one-time preprocessing (hoisted out of the per-call path) ---
    w1 = jnp.asarray(w1_torch, jnp.float32).T                      # (D, H)
    b1_2d = jnp.asarray(b1, jnp.float32).reshape(1, H)              # (1, H)
    w2_p = (jnp.zeros((H, C_pad), jnp.float32)
            .at[:, :C].set(jnp.asarray(w2_torch, jnp.float32).T))   # (H, C_pad)
    b2_p = (jnp.zeros((1, C_pad), jnp.float32)
            .at[:, :C].set(jnp.asarray(b2, jnp.float32)))           # (1, C_pad)
    w1, b1_2d, w2_p, b2_p = jax.device_put((w1, b1_2d, w2_p, b2_p))

    vmem = pl.BlockSpec(memory_space=pltpu.MemorySpace.VMEM)

    def _call_gridless(xp):
        B_pad = xp.shape[0]
        return pl.pallas_call(
            fc_kernel,
            out_shape=jax.ShapeDtypeStruct((B_pad, C_pad), jnp.float32),
            in_specs=[vmem, vmem, vmem, vmem, vmem],
            out_specs=vmem,
        )(xp, w1, b1_2d, w2_p, b2_p)

    def _call_tiled(xp):
        B_pad = xp.shape[0]
        tb = BATCH_TILE
        return pl.pallas_call(
            fc_kernel,
            out_shape=jax.ShapeDtypeStruct((B_pad, C_pad), jnp.float32),
            grid=(B_pad // tb,),
            in_specs=[
                pl.BlockSpec((tb, D), lambda i: (i, 0)),       # x tile
                pl.BlockSpec((D, H), lambda i: (0, 0)),        # w1 resident
                pl.BlockSpec((1, H), lambda i: (0, 0)),        # b1 resident
                pl.BlockSpec((H, C_pad), lambda i: (0, 0)),    # w2 resident
                pl.BlockSpec((1, C_pad), lambda i: (0, 0)),    # b2 resident
            ],
            out_specs=pl.BlockSpec((tb, C_pad), lambda i: (i, 0)),
            compiler_params=pltpu.CompilerParams(
                dimension_semantics=("parallel",)),
        )(xp, w1, b1_2d, w2_p, b2_p)

    def forward(x):
        B = x.shape[0]
        if B <= BATCH_TILE:
            # Small batch: gridless single-invocation path, pad to sublane (8).
            B_pad = _round_up(max(B, SUBLANE), SUBLANE)
            xp = jnp.pad(x, ((0, B_pad - B), (0, 0))) if B_pad != B else x
            out_padded = _call_gridless(xp)
        else:
            # Large batch: tile over batch, weights stay resident in VMEM.
            B_pad = _round_up(B, BATCH_TILE)
            xp = jnp.pad(x, ((0, B_pad - B), (0, 0))) if B_pad != B else x
            out_padded = _call_tiled(xp)
        # Single final slice back to the logical (B, C) result.
        return out_padded[:B, :C]

    return jax.jit(forward)


def reference_forward(x, w1_torch, b1, w2_torch, b2):
    h = jnp.maximum(x @ w1_torch.T + b1, 0.0)
    return jax.nn.sigmoid(h @ w2_torch.T + b2)


if __name__ == "__main__":
    # Small shapes consistent with FCModel(input_dim=32, num_classes=2)
    B, D, H, C = 16, 32, 256, 2

    key = jax.random.PRNGKey(0)
    kx, kw1, kb1, kw2, kb2 = jax.random.split(key, 5)

    x = jax.random.normal(kx, (B, D), dtype=jnp.float32)

    # Deterministic parameter init (Kaiming-uniform-ish bounds, like torch Linear),
    # in PyTorch layout: (out_features, in_features).
    lim1 = 1.0 / jnp.sqrt(D)
    lim2 = 1.0 / jnp.sqrt(H)
    w1 = jax.random.uniform(kw1, (H, D), jnp.float32, -lim1, lim1)
    b1 = jax.random.uniform(kb1, (H,), jnp.float32, -lim1, lim1)
    w2 = jax.random.uniform(kw2, (C, H), jnp.float32, -lim2, lim2)
    b2 = jax.random.uniform(kb2, (C,), jnp.float32, -lim2, lim2)

    # One-time parameter prep; per-call work is pad -> pallas_call -> slice.
    fc_forward = make_fc_forward(w1, b1, w2, b2)

    out = jax.block_until_ready(fc_forward(x))
    ref = jax.block_until_ready(reference_forward(x, w1, b1, w2, b2))
    assert out.shape == (B, C)
    assert jnp.allclose(out, ref, atol=1e-5, rtol=1e-5)

    # Also exercise the batch-tiled (gridded) path with a larger batch.
    B_big = 1040  # > BATCH_TILE, not a multiple of the tile -> exercises padding
    x_big = jax.random.normal(jax.random.PRNGKey(1), (B_big, D), dtype=jnp.float32)
    out_big = jax.block_until_ready(fc_forward(x_big))
    ref_big = jax.block_until_ready(reference_forward(x_big, w1, b1, w2, b2))
    assert out_big.shape == (B_big, C)
    assert jnp.allclose(out_big, ref_big, atol=1e-5, rtol=1e-5)

    print("KERNEL_OK")
</pallas_src>

<mosaic_0001>
module attributes {stable_mosaic.version = 11 : i64} {
  func.func @fc_kernel(%arg0: memref<16x32xf32, #tpu.memory_space<vmem>>, %arg1: memref<32x256xf32, #tpu.memory_space<vmem>>, %arg2: memref<1x256xf32, #tpu.memory_space<vmem>>, %arg3: memref<256x128xf32, #tpu.memory_space<vmem>>, %arg4: memref<1x128xf32, #tpu.memory_space<vmem>>, %arg5: memref<16x128xf32, #tpu.memory_space<vmem>>) attributes {dimension_semantics = [], scalar_prefetch = 0 : i64, scratch_operands = 0 : i64, tpu.core_type = #tpu.core_type<tc>} {
    %c0 = arith.constant 0 : index
    %c0_0 = arith.constant 0 : index
    %0 = vector.load %arg0[%c0, %c0_0] : memref<16x32xf32, #tpu.memory_space<vmem>>, vector<16x32xf32>
    %c0_1 = arith.constant 0 : index
    %c0_2 = arith.constant 0 : index
    %1 = vector.load %arg1[%c0_1, %c0_2] : memref<32x256xf32, #tpu.memory_space<vmem>>, vector<32x256xf32>
    %cst = arith.constant dense<0.000000e+00> : vector<16x256xf32>
    %2 = tpu.matmul %0, %1, %cst {dimension_numbers = #tpu.dot_dimension_numbers<[1], [0], [0], [1], [0, 0, 1, 1], [], []>} : vector<16x32xf32>, vector<32x256xf32>, vector<16x256xf32> -> vector<16x256xf32>
    %c0_3 = arith.constant 0 : index
    %c0_4 = arith.constant 0 : index
    %3 = vector.load %arg2[%c0_3, %c0_4] : memref<1x256xf32, #tpu.memory_space<vmem>>, vector<1x256xf32>
    %4 = vector.broadcast %3 : vector<1x256xf32> to vector<16x256xf32>
    %5 = arith.addf %2, %4 : vector<16x256xf32>
    %cst_5 = arith.constant 0.000000e+00 : f32
    %6 = vector.broadcast %cst_5 : f32 to vector<16x256xf32>
    %7 = arith.maximumf %5, %6 : vector<16x256xf32>
    %c0_6 = arith.constant 0 : index
    %c0_7 = arith.constant 0 : index
    %8 = vector.load %arg3[%c0_6, %c0_7] : memref<256x128xf32, #tpu.memory_space<vmem>>, vector<256x128xf32>
    %cst_8 = arith.constant dense<0.000000e+00> : vector<16x128xf32>
    %9 = tpu.matmul %7, %8, %cst_8 {dimension_numbers = #tpu.dot_dimension_numbers<[1], [0], [0], [1], [0, 0, 1, 1], [], []>} : vector<16x256xf32>, vector<256x128xf32>, vector<16x128xf32> -> vector<16x128xf32>
    %c0_9 = arith.constant 0 : index
    %c0_10 = arith.constant 0 : index
    %10 = vector.load %arg4[%c0_9, %c0_10] : memref<1x128xf32, #tpu.memory_space<vmem>>, vector<1x128xf32>
    %11 = vector.broadcast %10 : vector<1x128xf32> to vector<16x128xf32>
    %12 = arith.addf %9, %11 : vector<16x128xf32>
    %13 = arith.negf %12 : vector<16x128xf32>
    %14 = math.exp %13 : vector<16x128xf32>
    %cst_11 = arith.constant 1.000000e+00 : f32
    %15 = vector.broadcast %cst_11 : f32 to vector<16x128xf32>
    %16 = arith.addf %15, %14 : vector<16x128xf32>
    %17 = arith.divf %15, %16 : vector<16x128xf32>
    %c0_12 = arith.constant 0 : index
    %c0_13 = arith.constant 0 : index
    %18 = vector.load %arg5[%c0_12, %c0_13] : memref<16x128xf32, #tpu.memory_space<vmem>>, vector<16x128xf32>
    tpu.vector_store %arg5[%c0_12, %c0_13], %17 {strides = array<i32>} : memref<16x128xf32, #tpu.memory_space<vmem>>, vector<16x128xf32>,
    return
  }
}

</mosaic_0001>

<bundles_post_ra>
// kernel: forward.1
= control target key start
LH: loop header
LB: loop body
LE: loop exit
PB: predicated region body
PF: predicated region fallthrough
CT: control target
= control target key end

     0   :  { %10 = vsyncpa [#allocation3], 0  ;;  %s471_s0 = inlined_call_operand.hbm [shape: f32[16,32], index: 0, kind: input, shape index: {}]   ;;  %s472_s1 = inlined_call_operand.hbm [shape: f32[32,256], index: 1, kind: input, shape index: {}]   ;;  %s473_s2 = inlined_call_operand.hbm [shape: f32[1,256], index: 2, kind: input, shape index: {}]   ;;  %s474_s3 = inlined_call_operand.hbm [shape: f32[256,128], index: 3, kind: input, shape index: {}]   ;;  %s475_s4 = inlined_call_operand.vmem [shape: f32[1,128], index: 4, kind: input, shape index: {}]   ;;  %s476_s5 = inlined_call_operand.vmem [shape: f32[16,128], index: 5, kind: output, shape index: {}]  }
   0x1   :  { %11 = vsyncpa [#allocation5], 0  ;;  %s30_s20 = sshll.u32 %s472_s1, 4  ;;  %s31_s20 = int_to_ptr.hbm [resolvable:$true] %s30_s20 }
   0x2   :  { %12 = vsyncpa [#allocation8], 0  ;;  %s408_s21 = smov [#allocation4]   ;;  %s17_s25 = sshll.u32 %s471_s0, 4  ;;  %s18_s25 = int_to_ptr.hbm [resolvable:$true] %s17_s25 }
   0x3   :  { %s32_s22 = sshll.u32 %s408_s21, 4  ;;  %s409_s26 = smov 256   ;;  %s33_s22 = int_to_ptr.vmem [resolvable:$true] %s32_s22 }
   0x4   :  { %s410_s27 = smov 16   ;;  %s411_s28 = smov [#allocation2]  }
   0x5   :  { %38 = dma.hbm_to_vmem [thread:$0]  %s31_s20, 1024, %s33_s22, [#allocation5], %s409_s26, %s409_s26, %s410_s27  }
   0x6   :  { %s19_s29 = sshll.u32 %s411_s28, 4  ;;  %s412_s30 = smov 128   ;;  %s20_s29 = int_to_ptr.vmem [resolvable:$true] %s19_s29 }
   0x7   :  { %s413_s6 = smov 8   ;;  %s44_s8 = sshll.u32 %s473_s2, 4  ;;  %s45_s8 = int_to_ptr.hbm [resolvable:$true] %s44_s8 }
   0x8   :  { %25 = dma.hbm_to_vmem [thread:$0]  %s18_s25, 256, %s20_s29, [#allocation3], %s412_s30, %s412_s30, %s413_s6  }
   0x9   :  { %s414_s9 = smov [#allocation6]   ;;  %s54_s12 = sshll.u32 %s474_s3, 4  ;;  %s55_s12 = int_to_ptr.hbm [resolvable:$true] %s54_s12 }
   0xa   :  { %s46_s10 = sshll.u32 %s414_s9, 4  ;;  %s415_s13 = smov [#allocation7]   ;;  %s47_s10 = int_to_ptr.vmem [resolvable:$true] %s46_s10 }
   0xb   :  { %49 = dma.hbm_to_vmem [thread:$0]  %s45_s8, 32, %s47_s10, [#allocation5]  }
   0xc   :  { %s56_s14 = sshll.u32 %s415_s13, 4  ;;  %s57_s14 = int_to_ptr.vmem [resolvable:$true] %s56_s14 }
   0xd   :  { %62 = dma.hbm_to_vmem [thread:$0]  %s55_s12, 4096, %s57_s14, [#allocation8], %s412_s30, %s412_s30, %s413_s6  }
   0xe   :  { %402 = dma.done.wait [#allocation3], 256  }
   0xf   :  { %403 = vsyncadd [#allocation3], 4294967040 }
  0x10   :  { %404 = dma.done.wait [#allocation5], 1056  }
  0x11   :  { %405 = vsyncadd [#allocation5], 4294966240 }
  0x12   :  { %406 = dma.done.wait [#allocation8], 4096  }
  0x13   :  { %407 = vsyncadd [#allocation8], 4294963200  ;;  %v89_v0 = vld [vmem:[#allocation4 + $0x30] sm:$0xff]  ;;  %v87_v1 = vld [vmem:[#allocation4 + $0x20] sm:$0xff]  ;;  %vm97_vm0 = vcmask 261120  }
  0x14   :  { %v90_v2 = vld [vmem:[#allocation4 + $0x38] sm:$0xff]  ;;  %116 = vmatpush.msra.mxu0 %v89_v0  ;;  %v88_v3 = vld [vmem:[#allocation4 + $0x28] sm:$0xff]  ;;  %v85_v4 = vld [vmem:[#allocation4 + $0x10] sm:$0xff] }
  0x15   :  { %139 = vmatpush.msra.mxu1 %v90_v2  ;;  %v86_v5 = vld [vmem:[#allocation4 + $0x18] sm:$0xff]  ;;  %v83_v8 = vld [vmem:[#allocation4] sm:$0xff]  ;;  %v84_v9 = vld [vmem:[#allocation4 + $0x8] sm:$0xff] }
  0x16   :  { %117 = vmatpush.msra.mxu0 %v87_v1  ;;  %v169_v6 = vld [vmem:[#allocation7 + $0x78] sm:$0xff]  ;;  %v168_v7 = vld [vmem:[#allocation7 + $0x70] sm:$0xff]  ;;  %v167_v12 = vld [vmem:[#allocation7 + $0x68] sm:$0xff] }
  0x17   :  { %140 = vmatpush.msra.mxu1 %v88_v3  ;;  %190 = vmatpush.msra.mxu2 %v169_v6  ;;  %v185_v10 = vld [vmem:[#allocation7 + $0xf8] sm:$0xff]  ;;  %v81_v11 = vld [vmem:[#allocation2] sm:$0xff]  ;;  %v166_v14 = vld [vmem:[#allocation7 + $0x60] sm:$0xff] }
  0x18   :  { %118 = vmatpush.msra.mxu0 %v85_v4  ;;  %213 = vmatpush.msra.mxu3 %v185_v10  ;;  %v184_v13 = vld [vmem:[#allocation7 + $0xf0] sm:$0xff]  ;;  %v183_v15 = vld [vmem:[#allocation7 + $0xe8] sm:$0xff]  ;;  %v165_v16 = vld [vmem:[#allocation7 + $0x58] sm:$0xff] }
  0x19   :  { %141 = vmatpush.msra.mxu1 %v86_v5  ;;  %191 = vmatpush.msra.mxu2 %v168_v7  ;;  %v182_v17 = vld [vmem:[#allocation7 + $0xe0] sm:$0xff]  ;;  %v164_v18 = vld [vmem:[#allocation7 + $0x50] sm:$0xff]  ;;  %v181_v19 = vld [vmem:[#allocation7 + $0xd8] sm:$0xff] }
  0x1a   :  { %119 = vmatpush.msra.mxu0 %v83_v8  ;;  %214 = vmatpush.msra.mxu3 %v184_v13  ;;  %v82_v20 = vld [vmem:[#allocation2 + $0x8] sm:$0xff]  ;;  %v163_v21 = vld [vmem:[#allocation7 + $0x48] sm:$0xff]  ;;  %v162_v23 = vld [vmem:[#allocation7 + $0x40] sm:$0xff] }
  0x1b   :  { %142 = vmatpush.msra.mxu1 %v84_v9  ;;  %283 = vmatmul.msk.f32.vlgmr.msra.gmra.mxu0 %vm97_vm0, %v81_v11  ;;  %v180_v22 = vld [vmem:[#allocation7 + $0xd0] sm:$0xff]  ;;  %v179_v24 = vld [vmem:[#allocation7 + $0xc8] sm:$0xff]  ;;  %v161_v25 = vld [vmem:[#allocation7 + $0x38] sm:$0xff] }
  0x1c   :  { %285 = vmatmul.msk.f32.vlgmr.msra.gmra.mxu1 %vm97_vm0, %v81_v11  ;;  %192 = vmatpush.msra.mxu2 %v167_v12  ;;  %v178_v26 = vld [vmem:[#allocation7 + $0xc0] sm:$0xff]  ;;  %v160_v27 = vld [vmem:[#allocation7 + $0x30] sm:$0xff]  ;;  %v177_v28 = vld [vmem:[#allocation7 + $0xb8] sm:$0xff] }
  0x1d   :  { %215 = vmatpush.msra.mxu3 %v183_v15  ;;  %v159_v29 = vld [vmem:[#allocation7 + $0x28] sm:$0xff]  ;;  %v176_v30 = vld [vmem:[#allocation7 + $0xb0] sm:$0xff]  ;;  %v158_v31 = vld [vmem:[#allocation7 + $0x20] sm:$0xff] }
  0x1e   :  { %193 = vmatpush.msra.mxu2 %v166_v14  ;;  %v175_v32 = vld [vmem:[#allocation7 + $0xa8] sm:$0xff]  ;;  %v157_v33 = vld [vmem:[#allocation7 + $0x18] sm:$0xff]  ;;  %v174_v34 = vld [vmem:[#allocation7 + $0xa0] sm:$0xff] }
  0x1f   :  { %216 = vmatpush.msra.mxu3 %v182_v17  ;;  %v156_v35 = vld [vmem:[#allocation7 + $0x10] sm:$0xff]  ;;  %v173_v36 = vld [vmem:[#allocation7 + $0x98] sm:$0xff]  ;;  %v155_v37 = vld [vmem:[#allocation7 + $0x8] sm:$0xff] }
  0x20   :  { %194 = vmatpush.msra.mxu2 %v165_v16  ;;  %v172_v38 = vld [vmem:[#allocation7 + $0x90] sm:$0xff]  ;;  %v154_v39 = vld [vmem:[#allocation7] sm:$0xff]  ;;  %v171_v40 = vld [vmem:[#allocation7 + $0x88] sm:$0xff] }
  0x21   :  { %217 = vmatpush.msra.mxu3 %v181_v19  ;;  %v170_v41 = vld [vmem:[#allocation7 + $0x80] sm:$0xff]  ;;  %v91_v42 = vld [vmem:[#allocation6] sm:$0x3]  ;;  %v297_v57 = vld [vmem:[%s475_s4] ss:$0 sm:$0xff] }
  0x22   :  { %195 = vmatpush.msra.mxu2 %v164_v18  ;;  %v93_v43 = vperm.slane %v91_v42, 0  ;;  %v94_v44 = vperm.slane %v91_v42, 1 }
  0x23   :  { %284 = vmatmul.msk.f32.gmra.mxu0 %vm97_vm0, %v82_v20  ;;  %218 = vmatpush.msra.mxu3 %v180_v22 }
  0x24   :  { %286 = vmatmul.msk.f32.gmra.mxu1 %vm97_vm0, %v82_v20  ;;  %196 = vmatpush.msra.mxu2 %v163_v21 }
  0x25   :  { %219 = vmatpush.msra.mxu3 %v179_v24 }
  0x26   :  { %197 = vmatpush.msra.mxu2 %v162_v23 }
  0x27   :  { %220 = vmatpush.msra.mxu3 %v178_v26 }
  0x28   :  { %198 = vmatpush.msra.mxu2 %v161_v25 }
  0x29   :  { %221 = vmatpush.msra.mxu3 %v177_v28 }
  0x2a   :  { %199 = vmatpush.msra.mxu2 %v160_v27 }
  0x2b   :  { %222 = vmatpush.msra.mxu3 %v176_v30 }
  0x2c   :  { %200 = vmatpush.msra.mxu2 %v159_v29 }
  0x2d   :  { %223 = vmatpush.msra.mxu3 %v175_v32 }
  0x2e   :  { %201 = vmatpush.msra.mxu2 %v158_v31 }
  0x2f   :  { %224 = vmatpush.msra.mxu3 %v174_v34 }
  0x30   :  { %202 = vmatpush.msra.mxu2 %v157_v33 }
  0x31   :  { %225 = vmatpush.msra.mxu3 %v173_v36 }
  0x32   :  { %203 = vmatpush.msra.mxu2 %v156_v35 }
  0x33   :  { %226 = vmatpush.msra.mxu3 %v172_v38 }
  0x34   :  { %204 = vmatpush.msra.mxu2 %v155_v37 }
  0x35   :  { %227 = vmatpush.msra.mxu3 %v171_v40 }
  0x36   :  { %205 = vmatpush.msra.mxu2 %v154_v39 }
  0x37   :  { %228 = vmatpush.msra.mxu3 %v170_v41 }
  0x98   :  { %v121_v45 = vpop.f32.mrf.mxu0 }
  0x99   :  { %v144_v46 = vpop.f32.mrf.mxu1  ;;  %v122_v47 = vadd.f32 %v121_v45, %v93_v43 }
  0x9a   :  { %v145_v48 = vadd.f32 %v144_v46, %v94_v44 }
  0x9b   :  { %v150_v49 = vmax.f32 %v122_v47, 0.0 }
  0x9c   :  { %v151_v50 = vmax.f32 %v145_v48, 0.0 }
  0x9d   :  { %206 = vmatmul.f32.vlgmr.msra.gmra.mxu2 %v150_v49 }
  0x9e   :  { %229 = vmatmul.f32.vlgmr.msra.gmra.mxu3 %v151_v50 }
  0xa0   :  { %v124_v51 = vpop.f32.mrf.mxu0 }
  0xa1   :  { %v147_v52 = vpop.f32.mrf.mxu1  ;;  %v125_v53 = vadd.f32 %v124_v51, %v93_v43 }
  0xa2   :  { %v148_v54 = vadd.f32 %v147_v52, %v94_v44 }
  0xa3   :  { %v152_v55 = vmax.f32 %v125_v53, 0.0 }
  0xa4   :  { %v153_v56 = vmax.f32 %v148_v54, 0.0 }
  0xa5   :  { %209 = vmatmul.f32.gmra.mxu2 %v152_v55 }
  0xa6   :  { %232 = vmatmul.f32.gmra.mxu3 %v153_v56 }
 0x120   :  { %v207_v58 = vpop.f32.mrf.mxu2 }
 0x121   :  { %v230_v59 = vpop.f32.mrf.mxu3  ;;  %v208_v60 = vadd.f32 %v297_v57, %v207_v58 }
 0x123   :  { %v231_v61 = vadd.f32 %v230_v59, %v208_v60 }
 0x125   :  { %v287_v62 = vmul.f32 -1.442695, %v231_v61 }
 0x127   :  { %298 = vpow2.f32 %v287_v62 }
 0x128   :  { %v210_v63 = vpop.f32.mrf.mxu2 }
 0x129   :  { %v233_v0 = vpop.f32.mrf.mxu3  ;;  %v211_v1 = vadd.f32 %v297_v57, %v210_v63 }
 0x12b   :  { %v234_v2 = vadd.f32 %v233_v0, %v211_v1 }
 0x12d   :  { %v299_v3 = vpop.eup %298  ;;  %v288_v4 = vmul.f32 -1.442695, %v234_v2 }
 0x12e   :  { %v242_v5 = vadd.f32 1.0, %v299_v3 }
 0x12f   :  { %300 = vpow2.f32 %v288_v4 }
 0x130   :  { %302 = vrcp.f32 %v242_v5  ;;  %v255_v11 = vand.u32 2147483648, %v242_v5  ;;  %v253_v13 = vand.u32 2147483647, %v242_v5  ;;  %vm249_vm2 = vweird.f32 %v242_v5 }
 0x132   :  { %v256_v16 = vor.u32 1.1754944e-38, %v255_v11  ;;  %vm254_vm4 = vcmp.eq.f32.partialorder %v253_v13, 8.507059e+37 }
 0x135   :  { %v301_v6 = vpop.eup %300 }
 0x136   :  { %v303_v7 = vpop.eup %302  ;;  %v243_v8 = vadd.f32 1.0, %v301_v6 }
 0x137   :  { %v245_v9 = vmul.f32 %v303_v7, %v242_v5  ;;  %vm250_vm1 = vweird.f32 %v303_v7 }
 0x138   :  { %304 = vrcp.f32 %v243_v8  ;;  %vm251_vm3 = vmor %vm249_vm2, %vm250_vm1  ;;  %v270_v21 = vand.u32 2147483648, %v243_v8  ;;  %v268_v23 = vand.u32 2147483647, %v243_v8  ;;  %vm264_vm6 = vweird.f32 %v243_v8 }
 0x139   :  { %v246_v10 = vsub.f32 1.0, %v245_v9 }
 0x13a   :  { %v271_v25 = vor.u32 1.1754944e-38, %v270_v21  ;;  %vm269_vm8 = vcmp.eq.f32.partialorder %v268_v23, 8.507059e+37 }
 0x13b   :  { %v247_v12 = vmul.f32 %v303_v7, %v246_v10 }
 0x13d   :  { %v248_v14 = vadd.f32 %v303_v7, %v247_v12 }
 0x13e   :  { %v305_v15 = vpop.eup %304 }
 0x13f   :  { %v252_v17 = vsel %vm251_vm3, %v303_v7, %v248_v14  ;;  %v260_v18 = vmul.f32 %v305_v15, %v243_v8  ;;  %vm265_vm5 = vweird.f32 %v305_v15 }
 0x140   :  { %v257_v19 = vsel %vm254_vm4, %v256_v16, %v252_v17  ;;  %vm266_vm7 = vmor %vm264_vm6, %vm265_vm5 }
 0x141   :  { %274 = vst [vmem:[%s476_s5] sm:$0xff] %v257_v19  ;;  %v261_v20 = vsub.f32 1.0, %v260_v18 }
 0x143   :  { %v262_v22 = vmul.f32 %v305_v15, %v261_v20 }
 0x145   :  { %v263_v24 = vadd.f32 %v305_v15, %v262_v22 }
 0x147   :  { %v267_v26 = vsel %vm266_vm7, %v305_v15, %v263_v24 }
 0x148   :  { %v272_v27 = vsel %vm269_vm8, %v271_v25, %v267_v26 }
 0x149   :  { %275 = vst [vmem:[%s476_s5 + $0x8] sm:$0xff] %v272_v27 }
 0x14a   :  { %280 = vsyncpa [#allocation3], 1 }
 0x14b   :  { %281 = vsyncpa [#allocation5], 1 }
 0x14c   :  { %282 = vsyncpa [#allocation8], 1 }

</bundles_post_ra>
